<compile_context>
chip_gen: v5e
topology: v5e:2x2
jax: 0.10.0
libtpu: 0.0.40
codegen_flags: <defaults>
</compile_context>

<pallas_src>
import functools

import jax
import jax.numpy as jnp
from jax.experimental import pallas as pl
from jax.experimental.pallas import tpu as pltpu

LANES = 128
MAX_TILE_ROWS = 2048   # 2048 x 128 x 4 B = 1 MiB per f32 input block


def _round_up(a: int, b: int) -> int:
    return ((a + b - 1) // b) * b


def _dice_bce_kernel(x_ref, y_ref, out_ref, *, total, tile_rows, full_blocks):
    """Accumulates partial sums [q*y, q, y, bce] into a resident (4, 8, 128) block."""
    i = pl.program_id(0)

    @pl.when(i == 0)
    def _init():
        out_ref[...] = jnp.zeros_like(out_ref)

    x = x_ref[...].astype(jnp.float32)
    y = y_ref[...].astype(jnp.float32)

    p = jax.nn.sigmoid(x)        # sigmoid used by BCE
    q = jax.nn.sigmoid(p)        # DiceScore applies sigmoid again (keep the quirk)

    # PyTorch binary_cross_entropy clamps the log terms at -100.
    log_p = jnp.maximum(jnp.log(p), -100.0)
    log_1mp = jnp.maximum(jnp.log(1.0 - p), -100.0)
    bce = -(y * log_p + (1.0 - y) * log_1mp)
    qy = q * y

    n_vregs = tile_rows // 8

    def _vreg_sum(v):
        # (tile_rows, 128) -> (8, 128): tile-aligned reshape + leading-dim sum
        # = a chain of whole-vreg VALU adds (no cross-sublane XLU work).
        return v.reshape(n_vregs, 8, LANES).sum(axis=0)

    def _accum(qy_v, q_v, y_v, bce_v):
        # Four single-vreg RMWs on full (8,128) slices of the resident block.
        out_ref[0, :, :] += _vreg_sum(qy_v)
        out_ref[1, :, :] += _vreg_sum(q_v)
        out_ref[2, :, :] += _vreg_sum(y_v)
        out_ref[3, :, :] += _vreg_sum(bce_v)

    # Fast path: block is entirely inside the valid element range -> no mask.
    @pl.when(i < full_blocks)
    def _full():
        _accum(qy, q, y, bce)

    # Slow path: the (single) ragged last block.  Mask on the row index, with a
    # column test only for the one partial row (when total % 128 != 0).
    # jnp.where selects, so garbage / NaN in the Pallas pad region is discarded.
    @pl.when(i >= full_blocks)
    def _ragged():
        row = jax.lax.broadcasted_iota(jnp.int32, x.shape, 0) + i * tile_rows
        full_rows = total // LANES     # rows whose 128 lanes are all valid
        rem = total % LANES            # valid lanes in the single partial row
        if rem == 0:
            mask = row < full_rows
        else:
            col = jax.lax.broadcasted_iota(jnp.int32, x.shape, 1)
            mask = (row < full_rows) | ((row == full_rows) & (col < rem))
        _accum(jnp.where(mask, qy, 0.0),
               jnp.where(mask, q, 0.0),
               jnp.where(mask, y, 0.0),
               jnp.where(mask, bce, 0.0))


def dice_bce_loss(x, y, smooth: float = 1.0):
    """JAX/Pallas equivalent of DiceBCELoss.forward. Accepts any shape (e.g. NCHW).

    Inputs may be f32 / bf16 / fp16; the kernel upcasts to f32 internally, so
    bf16 callers halve the streamed HBM bytes on v5e/v6e where this is HBM-bound.
    """
    total = int(x.size)
    xf = x.reshape(-1)
    yf = y.reshape(-1)

    rows = pl.cdiv(total, LANES)
    if total % LANES != 0:
        # Only when numel is not a multiple of 128: a tiny (<128 element) pad
        # forms the lane-major 2-D view; padded elements are masked in-kernel.
        pad = rows * LANES - total
        xf = jnp.pad(xf, (0, pad))
        yf = jnp.pad(yf, (0, pad))
    x2 = xf.reshape(rows, LANES)   # free metadata op for contiguous arrays
    y2 = yf.reshape(rows, LANES)

    tile_rows = min(MAX_TILE_ROWS, _round_up(rows, 8))
    block_elems = tile_rows * LANES
    num_tiles = pl.cdiv(rows, tile_rows)
    full_blocks = total // block_elems       # grid steps that need no masking

    kernel = functools.partial(
        _dice_bce_kernel, total=total, tile_rows=tile_rows, full_blocks=full_blocks)

    partial_sums = pl.pallas_call(
        kernel,
        out_shape=jax.ShapeDtypeStruct((4, 8, LANES), jnp.float32),
        grid=(num_tiles,),
        in_specs=[
            pl.BlockSpec((tile_rows, LANES), lambda i: (i, 0)),
            pl.BlockSpec((tile_rows, LANES), lambda i: (i, 0)),
        ],
        out_specs=pl.BlockSpec((4, 8, LANES), lambda i: (0, 0, 0)),
        compiler_params=pltpu.CompilerParams(
            # Single reduction axis; output block resident across it.
            # Pipeline VMEM: 2 inputs x 2 buffers x 1 MiB = 4 MiB, far below the
            # scoped default on every generation, so no vmem_limit_bytes needed.
            dimension_semantics=("arbitrary",),
        ),
    )(x2, y2)

    # Cheap glue: fold the 8 sublanes and 128 lanes of each partial, combine.
    sums = partial_sums.sum(axis=(1, 2))   # [sum(q*y), sum(q), sum(y), sum(bce)]
    s_qy, s_q, s_y, s_bce = sums[0], sums[1], sums[2], sums[3]

    bce_mean = s_bce / total
    dice_score = (2.0 * s_qy + smooth) / (s_q + s_y + smooth)
    return bce_mean + (1.0 - dice_score)


def _reference(x, y, smooth=1.0):
    """Pure-JAX reference mirroring the PyTorch code, for a sanity check."""
    p = jax.nn.sigmoid(x.reshape(-1).astype(jnp.float32))
    t = y.reshape(-1).astype(jnp.float32)
    q = jax.nn.sigmoid(p)
    inter = jnp.sum(q * t)
    dice = (2.0 * inter + smooth) / (jnp.sum(q) + jnp.sum(t) + smooth)
    bce = jnp.mean(
        -(t * jnp.maximum(jnp.log(p), -100.0)
          + (1.0 - t) * jnp.maximum(jnp.log(1.0 - p), -100.0))
    )
    return bce + (1.0 - dice)


if __name__ == "__main__":
    loss_fn = jax.jit(dice_bce_loss)

    key = jax.random.PRNGKey(0)
    # Shapes cover: exact-block case, multi-row with ragged last block, and a
    # numel not divisible by 128 (partial-row mask path).
    shapes = [(2, 4, 16, 16), (2, 4, 96, 96), (2, 3, 13, 13)]
    for shape in shapes:
        key, kx, ky = jax.random.split(key, 3)
        x = jax.random.normal(kx, shape, dtype=jnp.float32)     # NCHW logits
        y = jax.random.uniform(ky, shape, dtype=jnp.float32)    # targets in [0, 1]

        loss = jax.block_until_ready(loss_fn(x, y))
        ref = jax.block_until_ready(_reference(x, y))
        assert jnp.allclose(loss, ref, rtol=1e-5, atol=1e-5), (shape, loss, ref)

    print("KERNEL_OK")
</pallas_src>

<mosaic_0001>
module attributes {stable_mosaic.version = 11 : i64} {
  func.func @_dice_bce_kernel(%arg0: i32, %arg1: memref<16x128xf32, #tpu.memory_space<vmem>>, %arg2: memref<16x128xf32, #tpu.memory_space<vmem>>, %arg3: memref<4x8x128xf32, #tpu.memory_space<vmem>>) attributes {dimension_semantics = [#tpu.dimension_semantics<arbitrary>], iteration_bounds = array<i64: 1>, scalar_prefetch = 0 : i64, scratch_operands = 0 : i64, tpu.core_type = #tpu.core_type<tc>, window_params = [{transform_indices = @transform_0, window_bounds = array<i64: 16, 128>}, {transform_indices = @transform_1, window_bounds = array<i64: 16, 128>}, {pipeline_mode = #tpu.pipeline_mode<synchronous>, transform_indices = @transform_2, window_bounds = array<i64: 4, 8, 128>}]} {
    %c0_i32 = arith.constant 0 : i32
    %0 = arith.cmpi eq, %arg0, %c0_i32 : i32
    %1 = arith.extui %0 : i1 to i32
    %c0_i32_0 = arith.constant 0 : i32
    %2 = arith.cmpi ne, %1, %c0_i32_0 : i32
    scf.if %2 {
      %cst_13 = arith.constant 0.000000e+00 : f32
      %37 = vector.broadcast %cst_13 : f32 to vector<4x8x128xf32>
      %c0_14 = arith.constant 0 : index
      %c0_15 = arith.constant 0 : index
      %c0_16 = arith.constant 0 : index
      %38 = vector.load %arg3[%c0_14, %c0_15, %c0_16] : memref<4x8x128xf32, #tpu.memory_space<vmem>>, vector<4x8x128xf32>
      tpu.vector_store %arg3[%c0_14, %c0_15, %c0_16], %37 {strides = array<i32>} : memref<4x8x128xf32, #tpu.memory_space<vmem>>, vector<4x8x128xf32>,
    } else {
    }
    %c0 = arith.constant 0 : index
    %c0_1 = arith.constant 0 : index
    %3 = vector.load %arg1[%c0, %c0_1] : memref<16x128xf32, #tpu.memory_space<vmem>>, vector<16x128xf32>
    %c0_2 = arith.constant 0 : index
    %c0_3 = arith.constant 0 : index
    %4 = vector.load %arg2[%c0_2, %c0_3] : memref<16x128xf32, #tpu.memory_space<vmem>>, vector<16x128xf32>
    %5 = arith.negf %3 : vector<16x128xf32>
    %6 = math.exp %5 : vector<16x128xf32>
    %cst = arith.constant 1.000000e+00 : f32
    %7 = vector.broadcast %cst : f32 to vector<16x128xf32>
    %8 = arith.addf %7, %6 : vector<16x128xf32>
    %9 = arith.divf %7, %8 : vector<16x128xf32>
    %10 = arith.negf %9 : vector<16x128xf32>
    %11 = math.exp %10 : vector<16x128xf32>
    %cst_4 = arith.constant 1.000000e+00 : f32
    %12 = vector.broadcast %cst_4 : f32 to vector<16x128xf32>
    %13 = arith.addf %12, %11 : vector<16x128xf32>
    %14 = arith.divf %12, %13 : vector<16x128xf32>
    %15 = math.log %9 : vector<16x128xf32>
    %cst_5 = arith.constant -1.000000e+02 : f32
    %16 = vector.broadcast %cst_5 : f32 to vector<16x128xf32>
    %17 = arith.maximumf %15, %16 : vector<16x128xf32>
    %cst_6 = arith.constant 1.000000e+00 : f32
    %18 = vector.broadcast %cst_6 : f32 to vector<16x128xf32>
    %19 = arith.subf %18, %9 : vector<16x128xf32>
    %20 = math.log %19 : vector<16x128xf32>
    %cst_7 = arith.constant -1.000000e+02 : f32
    %21 = vector.broadcast %cst_7 : f32 to vector<16x128xf32>
    %22 = arith.maximumf %20, %21 : vector<16x128xf32>
    %23 = arith.mulf %4, %17 : vector<16x128xf32>
    %cst_8 = arith.constant 1.000000e+00 : f32
    %24 = vector.broadcast %cst_8 : f32 to vector<16x128xf32>
    %25 = arith.subf %24, %4 : vector<16x128xf32>
    %26 = arith.mulf %25, %22 : vector<16x128xf32>
    %27 = arith.addf %23, %26 : vector<16x128xf32>
    %cst_9 = arith.constant 0.000000e+00 : f32
    %28 = vector.broadcast %cst_9 : f32 to vector<16x128xf32>
    %29 = arith.subf %28, %27 : vector<16x128xf32>
    %30 = arith.mulf %14, %4 : vector<16x128xf32>
    %c1_i32 = arith.constant 1 : i32
    %31 = arith.cmpi slt, %arg0, %c1_i32 : i32
    %32 = arith.extui %31 : i1 to i32
    %c0_i32_10 = arith.constant 0 : i32
    %33 = arith.cmpi ne, %32, %c0_i32_10 : i32
    scf.if %33 {
      %c0_13 = arith.constant 0 : index
      %c0_14 = arith.constant 0 : index
      %c0_15 = arith.constant 0 : index
      %37 = vector.load %arg3[%c0_13, %c0_14, %c0_15] : memref<4x8x128xf32, #tpu.memory_space<vmem>>, vector<1x8x128xf32>
      %38 = vector.shape_cast %37 : vector<1x8x128xf32> to vector<8x128xf32>
      %39 = vector.shape_cast %30 : vector<16x128xf32> to vector<2x8x128xf32>
      %cst_16 = arith.constant dense<0.000000e+00> : vector<8x128xf32>
      %40 = vector.multi_reduction <add>, %39, %cst_16 [0] : vector<2x8x128xf32> to vector<8x128xf32>
      %41 = arith.addf %38, %40 : vector<8x128xf32>
      %c0_17 = arith.constant 0 : index
      %c0_18 = arith.constant 0 : index
      %c0_19 = arith.constant 0 : index
      %42 = vector.load %arg3[%c0_17, %c0_18, %c0_19] : memref<4x8x128xf32, #tpu.memory_space<vmem>>, vector<1x8x128xf32>
      %43 = vector.shape_cast %42 : vector<1x8x128xf32> to vector<8x128xf32>
      %44 = vector.shape_cast %41 : vector<8x128xf32> to vector<1x8x128xf32>
      tpu.vector_store %arg3[%c0_17, %c0_18, %c0_19], %44 {strides = array<i32>} : memref<4x8x128xf32, #tpu.memory_space<vmem>>, vector<1x8x128xf32>,
      %c1 = arith.constant 1 : index
      %c0_20 = arith.constant 0 : index
      %c0_21 = arith.constant 0 : index
      %45 = vector.load %arg3[%c1, %c0_20, %c0_21] : memref<4x8x128xf32, #tpu.memory_space<vmem>>, vector<1x8x128xf32>
      %46 = vector.shape_cast %45 : vector<1x8x128xf32> to vector<8x128xf32>
      %47 = vector.shape_cast %14 : vector<16x128xf32> to vector<2x8x128xf32>
      %cst_22 = arith.constant dense<0.000000e+00> : vector<8x128xf32>
      %48 = vector.multi_reduction <add>, %47, %cst_22 [0] : vector<2x8x128xf32> to vector<8x128xf32>
      %49 = arith.addf %46, %48 : vector<8x128xf32>
      %c1_23 = arith.constant 1 : index
      %c0_24 = arith.constant 0 : index
      %c0_25 = arith.constant 0 : index
      %50 = vector.load %arg3[%c1_23, %c0_24, %c0_25] : memref<4x8x128xf32, #tpu.memory_space<vmem>>, vector<1x8x128xf32>
      %51 = vector.shape_cast %50 : vector<1x8x128xf32> to vector<8x128xf32>
      %52 = vector.shape_cast %49 : vector<8x128xf32> to vector<1x8x128xf32>
      tpu.vector_store %arg3[%c1_23, %c0_24, %c0_25], %52 {strides = array<i32>} : memref<4x8x128xf32, #tpu.memory_space<vmem>>, vector<1x8x128xf32>,
      %c2 = arith.constant 2 : index
      %c0_26 = arith.constant 0 : index
      %c0_27 = arith.constant 0 : index
      %53 = vector.load %arg3[%c2, %c0_26, %c0_27] : memref<4x8x128xf32, #tpu.memory_space<vmem>>, vector<1x8x128xf32>
      %54 = vector.shape_cast %53 : vector<1x8x128xf32> to vector<8x128xf32>
      %55 = vector.shape_cast %4 : vector<16x128xf32> to vector<2x8x128xf32>
      %cst_28 = arith.constant dense<0.000000e+00> : vector<8x128xf32>
      %56 = vector.multi_reduction <add>, %55, %cst_28 [0] : vector<2x8x128xf32> to vector<8x128xf32>
      %57 = arith.addf %54, %56 : vector<8x128xf32>
      %c2_29 = arith.constant 2 : index
      %c0_30 = arith.constant 0 : index
      %c0_31 = arith.constant 0 : index
      %58 = vector.load %arg3[%c2_29, %c0_30, %c0_31] : memref<4x8x128xf32, #tpu.memory_space<vmem>>, vector<1x8x128xf32>
      %59 = vector.shape_cast %58 : vector<1x8x128xf32> to vector<8x128xf32>
      %60 = vector.shape_cast %57 : vector<8x128xf32> to vector<1x8x128xf32>
      tpu.vector_store %arg3[%c2_29, %c0_30, %c0_31], %60 {strides = array<i32>} : memref<4x8x128xf32, #tpu.memory_space<vmem>>, vector<1x8x128xf32>,
      %c3 = arith.constant 3 : index
      %c0_32 = arith.constant 0 : index
      %c0_33 = arith.constant 0 : index
      %61 = vector.load %arg3[%c3, %c0_32, %c0_33] : memref<4x8x128xf32, #tpu.memory_space<vmem>>, vector<1x8x128xf32>
      %62 = vector.shape_cast %61 : vector<1x8x128xf32> to vector<8x128xf32>
      %63 = vector.shape_cast %29 : vector<16x128xf32> to vector<2x8x128xf32>
      %cst_34 = arith.constant dense<0.000000e+00> : vector<8x128xf32>
      %64 = vector.multi_reduction <add>, %63, %cst_34 [0] : vector<2x8x128xf32> to vector<8x128xf32>
      %65 = arith.addf %62, %64 : vector<8x128xf32>
      %c3_35 = arith.constant 3 : index
      %c0_36 = arith.constant 0 : index
      %c0_37 = arith.constant 0 : index
      %66 = vector.load %arg3[%c3_35, %c0_36, %c0_37] : memref<4x8x128xf32, #tpu.memory_space<vmem>>, vector<1x8x128xf32>
      %67 = vector.shape_cast %66 : vector<1x8x128xf32> to vector<8x128xf32>
      %68 = vector.shape_cast %65 : vector<8x128xf32> to vector<1x8x128xf32>
      tpu.vector_store %arg3[%c3_35, %c0_36, %c0_37], %68 {strides = array<i32>} : memref<4x8x128xf32, #tpu.memory_space<vmem>>, vector<1x8x128xf32>,
    } else {
    }
    %c1_i32_11 = arith.constant 1 : i32
    %34 = arith.cmpi sge, %arg0, %c1_i32_11 : i32
    %35 = arith.extui %34 : i1 to i32
    %c0_i32_12 = arith.constant 0 : i32
    %36 = arith.cmpi ne, %35, %c0_i32_12 : i32
    scf.if %36 {
      %37 = tpu.iota {dimensions = array<i32: 0>} : vector<16x128xi32>
      %c16_i32 = arith.constant 16 : i32
      %38 = arith.muli %arg0, %c16_i32 : i32
      %39 = vector.broadcast %38 : i32 to vector<16x128xi32>
      %40 = arith.addi %37, %39 : vector<16x128xi32>
      %c16_i32_13 = arith.constant 16 : i32
      %41 = vector.broadcast %c16_i32_13 : i32 to vector<16x128xi32>
      %42 = arith.cmpi slt, %40, %41 : vector<16x128xi32>
      %cst_14 = arith.constant 0.000000e+00 : f32
      %43 = vector.broadcast %cst_14 : f32 to vector<16x128xf32>
      %44 = arith.select %42, %30, %43 : vector<16x128xi1>, vector<16x128xf32>
      %cst_15 = arith.constant 0.000000e+00 : f32
      %45 = vector.broadcast %cst_15 : f32 to vector<16x128xf32>
      %46 = arith.select %42, %14, %45 : vector<16x128xi1>, vector<16x128xf32>
      %cst_16 = arith.constant 0.000000e+00 : f32
      %47 = vector.broadcast %cst_16 : f32 to vector<16x128xf32>
      %48 = arith.select %42, %4, %47 : vector<16x128xi1>, vector<16x128xf32>
      %cst_17 = arith.constant 0.000000e+00 : f32
      %49 = vector.broadcast %cst_17 : f32 to vector<16x128xf32>
      %50 = arith.select %42, %29, %49 : vector<16x128xi1>, vector<16x128xf32>
      %c0_18 = arith.constant 0 : index
      %c0_19 = arith.constant 0 : index
      %c0_20 = arith.constant 0 : index
      %51 = vector.load %arg3[%c0_18, %c0_19, %c0_20] : memref<4x8x128xf32, #tpu.memory_space<vmem>>, vector<1x8x128xf32>
      %52 = vector.shape_cast %51 : vector<1x8x128xf32> to vector<8x128xf32>
      %53 = vector.shape_cast %44 : vector<16x128xf32> to vector<2x8x128xf32>
      %cst_21 = arith.constant dense<0.000000e+00> : vector<8x128xf32>
      %54 = vector.multi_reduction <add>, %53, %cst_21 [0] : vector<2x8x128xf32> to vector<8x128xf32>
      %55 = arith.addf %52, %54 : vector<8x128xf32>
      %c0_22 = arith.constant 0 : index
      %c0_23 = arith.constant 0 : index
      %c0_24 = arith.constant 0 : index
      %56 = vector.load %arg3[%c0_22, %c0_23, %c0_24] : memref<4x8x128xf32, #tpu.memory_space<vmem>>, vector<1x8x128xf32>
      %57 = vector.shape_cast %56 : vector<1x8x128xf32> to vector<8x128xf32>
      %58 = vector.shape_cast %55 : vector<8x128xf32> to vector<1x8x128xf32>
      tpu.vector_store %arg3[%c0_22, %c0_23, %c0_24], %58 {strides = array<i32>} : memref<4x8x128xf32, #tpu.memory_space<vmem>>, vector<1x8x128xf32>,
      %c1 = arith.constant 1 : index
      %c0_25 = arith.constant 0 : index
      %c0_26 = arith.constant 0 : index
      %59 = vector.load %arg3[%c1, %c0_25, %c0_26] : memref<4x8x128xf32, #tpu.memory_space<vmem>>, vector<1x8x128xf32>
      %60 = vector.shape_cast %59 : vector<1x8x128xf32> to vector<8x128xf32>
      %61 = vector.shape_cast %46 : vector<16x128xf32> to vector<2x8x128xf32>
      %cst_27 = arith.constant dense<0.000000e+00> : vector<8x128xf32>
      %62 = vector.multi_reduction <add>, %61, %cst_27 [0] : vector<2x8x128xf32> to vector<8x128xf32>
      %63 = arith.addf %60, %62 : vector<8x128xf32>
      %c1_28 = arith.constant 1 : index
      %c0_29 = arith.constant 0 : index
      %c0_30 = arith.constant 0 : index
      %64 = vector.load %arg3[%c1_28, %c0_29, %c0_30] : memref<4x8x128xf32, #tpu.memory_space<vmem>>, vector<1x8x128xf32>
      %65 = vector.shape_cast %64 : vector<1x8x128xf32> to vector<8x128xf32>
      %66 = vector.shape_cast %63 : vector<8x128xf32> to vector<1x8x128xf32>
      tpu.vector_store %arg3[%c1_28, %c0_29, %c0_30], %66 {strides = array<i32>} : memref<4x8x128xf32, #tpu.memory_space<vmem>>, vector<1x8x128xf32>,
      %c2 = arith.constant 2 : index
      %c0_31 = arith.constant 0 : index
      %c0_32 = arith.constant 0 : index
      %67 = vector.load %arg3[%c2, %c0_31, %c0_32] : memref<4x8x128xf32, #tpu.memory_space<vmem>>, vector<1x8x128xf32>
      %68 = vector.shape_cast %67 : vector<1x8x128xf32> to vector<8x128xf32>
      %69 = vector.shape_cast %48 : vector<16x128xf32> to vector<2x8x128xf32>
      %cst_33 = arith.constant dense<0.000000e+00> : vector<8x128xf32>
      %70 = vector.multi_reduction <add>, %69, %cst_33 [0] : vector<2x8x128xf32> to vector<8x128xf32>
      %71 = arith.addf %68, %70 : vector<8x128xf32>
      %c2_34 = arith.constant 2 : index
      %c0_35 = arith.constant 0 : index
      %c0_36 = arith.constant 0 : index
      %72 = vector.load %arg3[%c2_34, %c0_35, %c0_36] : memref<4x8x128xf32, #tpu.memory_space<vmem>>, vector<1x8x128xf32>
      %73 = vector.shape_cast %72 : vector<1x8x128xf32> to vector<8x128xf32>
      %74 = vector.shape_cast %71 : vector<8x128xf32> to vector<1x8x128xf32>
      tpu.vector_store %arg3[%c2_34, %c0_35, %c0_36], %74 {strides = array<i32>} : memref<4x8x128xf32, #tpu.memory_space<vmem>>, vector<1x8x128xf32>,
      %c3 = arith.constant 3 : index
      %c0_37 = arith.constant 0 : index
      %c0_38 = arith.constant 0 : index
      %75 = vector.load %arg3[%c3, %c0_37, %c0_38] : memref<4x8x128xf32, #tpu.memory_space<vmem>>, vector<1x8x128xf32>
      %76 = vector.shape_cast %75 : vector<1x8x128xf32> to vector<8x128xf32>
      %77 = vector.shape_cast %50 : vector<16x128xf32> to vector<2x8x128xf32>
      %cst_39 = arith.constant dense<0.000000e+00> : vector<8x128xf32>
      %78 = vector.multi_reduction <add>, %77, %cst_39 [0] : vector<2x8x128xf32> to vector<8x128xf32>
      %79 = arith.addf %76, %78 : vector<8x128xf32>
      %c3_40 = arith.constant 3 : index
      %c0_41 = arith.constant 0 : index
      %c0_42 = arith.constant 0 : index
      %80 = vector.load %arg3[%c3_40, %c0_41, %c0_42] : memref<4x8x128xf32, #tpu.memory_space<vmem>>, vector<1x8x128xf32>
      %81 = vector.shape_cast %80 : vector<1x8x128xf32> to vector<8x128xf32>
      %82 = vector.shape_cast %79 : vector<8x128xf32> to vector<1x8x128xf32>
      tpu.vector_store %arg3[%c3_40, %c0_41, %c0_42], %82 {strides = array<i32>} : memref<4x8x128xf32, #tpu.memory_space<vmem>>, vector<1x8x128xf32>,
    } else {
    }
    return
  }
  func.func @transform_0(%arg0: i32) -> (i32, i32) {
    %c0_i32 = arith.constant 0 : i32
    %c0_i32_0 = arith.constant 0 : i32
    return %arg0, %c0_i32 : i32, i32
  }
  func.func @transform_1(%arg0: i32) -> (i32, i32) {
    %c0_i32 = arith.constant 0 : i32
    %c0_i32_0 = arith.constant 0 : i32
    return %arg0, %c0_i32 : i32, i32
  }
  func.func @transform_2(%arg0: i32) -> (i32, i32, i32) {
    %c0_i32 = arith.constant 0 : i32
    %c0_i32_0 = arith.constant 0 : i32
    %c0_i32_1 = arith.constant 0 : i32
    %c0_i32_2 = arith.constant 0 : i32
    return %c0_i32, %c0_i32_0, %c0_i32_1 : i32, i32, i32
  }
}

</mosaic_0001>

<bundles_post_ra>
// kernel: dice_bce_loss.1
= control target key start
LH: loop header
LB: loop body
LE: loop exit
PB: predicated region body
PF: predicated region fallthrough
CT: control target
= control target key end

     0   :  { %s286_s0 = inlined_call_operand.vmem [shape: f32[16,128], index: 0, kind: input, shape index: {}]   ;;  %s287_s1 = inlined_call_operand.vmem [shape: f32[16,128], index: 1, kind: input, shape index: {}]   ;;  %s288_s2 = inlined_call_operand.vmem [shape: f32[4,8,128], index: 2, kind: output, shape index: {}]  }
   0x1   :  { %v19_v0 = vld [vmem:[%s286_s0] sm:$0xff]  ;;  %v20_v1 = vld [vmem:[%s286_s0 + $0x8] sm:$0xff] }
   0x2   :  { %v192_v2 = vmul.f32 -1.442695, %v19_v0  ;;  %v193_v3 = vmul.f32 -1.442695, %v20_v1  ;;  %v257_v24 = vld [vmem:[%s287_s1] sm:$0xff]  ;;  %v262_v25 = vld [vmem:[%s287_s1 + $0x8] sm:$0xff] }
   0x3   :  { %v140_v29 = vadd.f32 %v262_v25, %v257_v24  ;;  %v115_v49 = vsub.f32 1.0, %v257_v24  ;;  %v116_v50 = vsub.f32 1.0, %v262_v25 }
   0x4   :  { %209 = vpow2.f32 %v192_v2 }
   0x5   :  { %211 = vpow2.f32 %v193_v3  ;;  %199 = vst [vmem:[%s288_s2 + $0x10] sm:$0xff] %v140_v29 }
   0xa   :  { %v210_v4 = vpop.eup %209 }
   0xb   :  { %v212_v5 = vpop.eup %211  ;;  %v29_v6 = vadd.f32 1.0, %v210_v4 }
   0xc   :  { %v30_v7 = vadd.f32 1.0, %v212_v5 }
   0xd   :  { %213 = vrcp.f32 %v29_v6  ;;  %vm36_vm0 = vweird.f32 %v29_v6  ;;  %v42_v11 = vand.u32 2147483648, %v29_v6  ;;  %v40_v14 = vand.u32 2147483647, %v29_v6 }
   0xe   :  { %215 = vrcp.f32 %v30_v7  ;;  %v57_v15 = vand.u32 2147483648, %v30_v7  ;;  %vm51_vm2 = vweird.f32 %v30_v7  ;;  %v55_v17 = vand.u32 2147483647, %v30_v7 }
   0xf   :  { %v43_v19 = vor.u32 1.1754944e-38, %v42_v11  ;;  %vm41_vm5 = vcmp.eq.f32.partialorder %v40_v14, 8.507059e+37 }
  0x10   :  { %v58_v22 = vor.u32 1.1754944e-38, %v57_v15  ;;  %vm56_vm7 = vcmp.eq.f32.partialorder %v55_v17, 8.507059e+37 }
  0x13   :  { %v214_v8 = vpop.eup %213 }
  0x14   :  { %v216_v9 = vpop.eup %215  ;;  %v32_v10 = vmul.f32 %v214_v8, %v29_v6  ;;  %vm37_vm1 = vweird.f32 %v214_v8 }
  0x15   :  { %v47_v12 = vmul.f32 %v216_v9, %v30_v7  ;;  %vm52_vm3 = vweird.f32 %v216_v9  ;;  %vm38_vm4 = vmor %vm36_vm0, %vm37_vm1 }
  0x16   :  { %v33_v13 = vsub.f32 1.0, %v32_v10  ;;  %vm53_vm6 = vmor %vm51_vm2, %vm52_vm3 }
  0x17   :  { %v48_v16 = vsub.f32 1.0, %v47_v12 }
  0x18   :  { %v34_v18 = vmul.f32 %v214_v8, %v33_v13 }
  0x19   :  { %v49_v20 = vmul.f32 %v216_v9, %v48_v16 }
  0x1a   :  { %v35_v21 = vadd.f32 %v214_v8, %v34_v18 }
  0x1b   :  { %v50_v23 = vadd.f32 %v216_v9, %v49_v20 }
  0x1c   :  { %v39_v26 = vsel %vm38_vm4, %v214_v8, %v35_v21 }
  0x1d   :  { %v44_v27 = vsel %vm41_vm5, %v43_v19, %v39_v26  ;;  %v54_v28 = vsel %vm53_vm6, %v216_v9, %v50_v23 }
  0x1e   :  { %v59_v30 = vsel %vm56_vm7, %v58_v22, %v54_v28  ;;  %v194_v31 = vmul.f32 -1.442695, %v44_v27  ;;  %217 = vlog2.f32 %v44_v27  ;;  %v105_v32 = vsub.f32 1.0, %v44_v27 }
  0x1f   :  { %v195_v33 = vmul.f32 -1.442695, %v59_v30  ;;  %219 = vlog2.f32 %v59_v30  ;;  %v106_v34 = vsub.f32 1.0, %v59_v30 }
  0x20   :  { %221 = vpow2.f32 %v194_v31 }
  0x21   :  { %223 = vpow2.f32 %v195_v33 }
  0x22   :  { %225 = vlog2.f32 %v105_v32 }
  0x23   :  { %227 = vlog2.f32 %v106_v34 }
  0x24   :  { %v218_v35 = vpop.eup %217 }
  0x25   :  { %v220_v36 = vpop.eup %219  ;;  %v100_v37 = vmul.f32 0.6931472, %v218_v35 }
  0x26   :  { %v222_v38 = vpop.eup %221  ;;  %v102_v39 = vmul.f32 0.6931472, %v220_v36 }
  0x27   :  { %v224_v40 = vpop.eup %223  ;;  %v67_v41 = vadd.f32 1.0, %v222_v38  ;;  %v103_v45 = vmax.f32 %v100_v37, -100.0 }
  0x28   :  { %v226_v42 = vpop.eup %225  ;;  %v68_v43 = vadd.f32 1.0, %v224_v40  ;;  %v104_v46 = vmax.f32 %v102_v39, -100.0 }
  0x29   :  { %v228_v44 = vpop.eup %227  ;;  %229 = vrcp.f32 %v67_v41  ;;  %v108_v47 = vmul.f32 0.6931472, %v226_v42  ;;  %v113_v53 = vmul.f32 %v103_v45, %v257_v24  ;;  %vm74_vm8 = vweird.f32 %v67_v41 }
  0x2a   :  { %231 = vrcp.f32 %v68_v43  ;;  %v110_v48 = vmul.f32 0.6931472, %v228_v44  ;;  %v114_v54 = vmul.f32 %v104_v46, %v262_v25  ;;  %v78_v60 = vand.u32 2147483647, %v67_v41 }
  0x2b   :  { %v111_v51 = vmax.f32 %v108_v47, -100.0  ;;  %v80_v61 = vand.u32 2147483648, %v67_v41  ;;  %vm89_vm9 = vweird.f32 %v68_v43  ;;  %v93_v2 = vand.u32 2147483647, %v68_v43 }
  0x2c   :  { %v112_v52 = vmax.f32 %v110_v48, -100.0  ;;  %v95_v3 = vand.u32 2147483648, %v68_v43  ;;  %vm79_vm13 = vcmp.eq.f32.partialorder %v78_v60, 8.507059e+37 }
  0x2d   :  { %v117_v56 = vmul.f32 %v115_v49, %v111_v51  ;;  %v81_v8 = vor.u32 1.1754944e-38, %v80_v61  ;;  %vm94_vm15 = vcmp.eq.f32.partialorder %v93_v2, 8.507059e+37 }
  0x2e   :  { %v118_v57 = vmul.f32 %v116_v50, %v112_v52  ;;  %v96_v12 = vor.u32 1.1754944e-38, %v95_v3 }
  0x2f   :  { %v230_v55 = vpop.eup %229  ;;  %v119_v63 = vadd.f32 %v117_v56, %v113_v53 }
  0x30   :  { %v232_v58 = vpop.eup %231  ;;  %v70_v59 = vmul.f32 %v230_v55, %v67_v41  ;;  %v120_v0 = vadd.f32 %v118_v57, %v114_v54  ;;  %vm75_vm10 = vweird.f32 %v230_v55 }
  0x31   :  { %v85_v62 = vmul.f32 %v232_v58, %v68_v43  ;;  %vm90_vm11 = vweird.f32 %v232_v58  ;;  %v121_v5 = vsub.f32 0.0, %v119_v63  ;;  %vm76_vm12 = vmor %vm74_vm8, %vm75_vm10 }
  0x32   :  { %v71_v1 = vsub.f32 1.0, %v70_v59  ;;  %v122_v6 = vsub.f32 0.0, %v120_v0  ;;  %vm91_vm14 = vmor %vm89_vm9, %vm90_vm11 }
  0x33   :  { %v86_v4 = vsub.f32 1.0, %v85_v62 }
  0x34   :  { %v72_v7 = vmul.f32 %v230_v55, %v71_v1  ;;  %v145_v10 = vadd.f32 %v122_v6, %v121_v5 }
  0x35   :  { %v87_v9 = vmul.f32 %v232_v58, %v86_v4 }
  0x36   :  { %v73_v11 = vadd.f32 %v230_v55, %v72_v7  ;;  %201 = vst [vmem:[%s288_s2 + $0x18] sm:$0xff] %v145_v10 }
  0x37   :  { %v88_v13 = vadd.f32 %v232_v58, %v87_v9 }
  0x38   :  { %v77_v14 = vsel %vm76_vm12, %v230_v55, %v73_v11 }
  0x39   :  { %v82_v15 = vsel %vm79_vm13, %v81_v8, %v77_v14  ;;  %v92_v16 = vsel %vm91_vm14, %v232_v58, %v88_v13 }
  0x3a   :  { %v97_v17 = vsel %vm94_vm15, %v96_v12, %v92_v16  ;;  %v123_v18 = vmul.f32 %v82_v15, %v257_v24 }
  0x3b   :  { %v124_v19 = vmul.f32 %v97_v17, %v262_v25  ;;  %v135_v20 = vadd.f32 %v97_v17, %v82_v15 }
  0x3d   :  { %v130_v21 = vadd.f32 %v124_v19, %v123_v18  ;;  %197 = vst [vmem:[%s288_s2 + $0x8] sm:$0xff] %v135_v20 }
  0x3f   :  { %132 = vst [vmem:[%s288_s2] sm:$0xff] %v130_v21 }

</bundles_post_ra>
